<compile_context>
chip_gen: v5e
topology: v5e:2x2
jax: 0.10.0
libtpu: 0.0.40
codegen_flags: <defaults>
</compile_context>

<pallas_src>
import functools

import jax
import jax.numpy as jnp
import numpy as np
from jax.experimental import pallas as pl
from jax.experimental.pallas import tpu as pltpu


LN_EPS = 1e-5  # PyTorch nn.LayerNorm default


def _round_up(x, m):
    return (x + m - 1) // m * m


@functools.lru_cache(maxsize=1)
def _vmem_capacity_bytes():
    try:
        return int(pltpu.get_tpu_info().vmem_capacity_bytes)
    except Exception:  # conservative fallback that fits every generation (incl. v7x)
        return 64 * 1024 * 1024


def _make_rep_spec_factory():
    """Constant-index-map parameter specs, single-buffered when the API allows it."""
    try:
        pl.BlockSpec((1, 1), lambda *_: (0, 0), pipeline_mode=pl.Buffered(1))

        def make(shape):
            return pl.BlockSpec(shape, lambda *_: (0,) * len(shape),
                                pipeline_mode=pl.Buffered(1))

        return make, 1
    except Exception:
        def make(shape):
            return pl.BlockSpec(shape, lambda *_: (0,) * len(shape))

        return make, 2


_REP_SPEC, _PARAM_BUFFERS = _make_rep_spec_factory()


def _layernorm_relu(h, gamma, beta):
    """Two-pass LayerNorm (affine, eps=1e-5) followed by ReLU, all in f32."""
    mu = jnp.mean(h, axis=-1, keepdims=True)
    d = h - mu
    var = jnp.mean(d * d, axis=-1, keepdims=True)
    y = d * jax.lax.rsqrt(var + LN_EPS) * gamma + beta
    return jnp.maximum(y, 0.0)


def value_critic_kernel(
    x_ref,
    w1_ref, b1_ref, g1_ref, be1_ref,
    w2_ref, b2_ref, g2_ref, be2_ref,
    w3_ref, b3_ref,
    w4_ref, b4_ref,
    out_ref,
    *,
    compute_dtype,
):
    def mm(a, b):
        return jnp.dot(a.astype(compute_dtype), b.astype(compute_dtype),
                       preferred_element_type=jnp.float32)

    x = x_ref[...].astype(jnp.float32)

    # Linear -> LayerNorm -> ReLU
    h = mm(x, w1_ref[...]) + b1_ref[...]
    h = _layernorm_relu(h, g1_ref[...], be1_ref[...])

    # Linear -> LayerNorm -> ReLU
    h = mm(h, w2_ref[...]) + b2_ref[...]
    h = _layernorm_relu(h, g2_ref[...], be2_ref[...])

    # value head: Linear -> ReLU
    h = mm(h, w3_ref[...]) + b3_ref[...]
    h = jnp.maximum(h, 0.0)

    # Final Linear(H2 -> 1): contract the last dims of the (1, H2) weight row and
    # (block_b, H2) activations -> lane-dense (1, block_b). No explicit h.T
    # materialization (the MXU is fed the transposed operand directly) and the output
    # path uses unmasked full-lane stores.
    v = jax.lax.dot_general(
        w4_ref[...].astype(compute_dtype), h.astype(compute_dtype),
        dimension_numbers=(((1,), (1,)), ((), ())),
        preferred_element_type=jnp.float32,
    ) + b4_ref[...]

    out_ref[...] = v.astype(out_ref.dtype)


@functools.partial(jax.jit, static_argnames=("block_b", "use_bf16"))
def value_critic_forward(state, params, *, block_b=1024, use_bf16=False):
    """state: (B, state_dim) float32 -> (B, 1) float32."""
    B, state_dim = state.shape
    (w1, b1, g1, be1, w2, b2, g2, be2, w3, b3, w4, b4) = params
    H = w1.shape[1]
    H2 = w3.shape[1]

    # --- batch tiling ------------------------------------------------------------
    if B > block_b:
        assert block_b % 128 == 0, "block_b must be a multiple of 128"
        bb = block_b
    elif B >= 256:
        # >= 2 grid steps so both TensorCores are used on v7x (split via
        # dimension_semantics=("parallel",)); harmless on single-TC v5e/v6e.
        bb = _round_up(pl.cdiv(B, 2), 128)
    else:
        bb = _round_up(B, 8)

    # --- VMEM budget (generation aware) -------------------------------------------
    param_bytes = sum(
        int(np.prod(p.shape)) * p.dtype.itemsize
        for p in (w1, b1, g1, be1, w2, b2, g2, be2, w3, b3, w4, b4)
    )

    def _need(bb_):
        act = 4 * bb_ * (state_dim + 2 * H + H2)       # in-kernel activation temps
        io = 2 * 4 * bb_ * state_dim + 2 * 4 * bb_     # double-buffered x + out tiles
        return _PARAM_BUFFERS * param_bytes + act + io

    budget = int(0.8 * _vmem_capacity_bytes())          # headroom for Mosaic scratch
    while bb >= 512 and _need(bb) > budget:
        bb //= 2
    vmem_limit = int(min(max(int(_need(bb) * 1.4) + (8 << 20), 32 << 20), budget))

    n_blocks = pl.cdiv(B, bb)
    grid = (n_blocks,)

    # Broadcastable (1, F) row views of the 1-D parameters.
    b1r, g1r, be1r = b1[None, :], g1[None, :], be1[None, :]
    b2r, g2r, be2r = b2[None, :], g2[None, :], be2[None, :]
    b3r = b3[None, :]
    w4r = w4.reshape(1, H2)           # (H2, 1) -> (1, H2) row for the NT head matmul
    b4r = b4.reshape(1, 1)

    in_specs = [
        pl.BlockSpec((bb, state_dim), lambda i: (i, 0)),                  # x slab
        _REP_SPEC((state_dim, H)), _REP_SPEC((1, H)),                     # layer 1
        _REP_SPEC((1, H)), _REP_SPEC((1, H)),
        _REP_SPEC((H, H)), _REP_SPEC((1, H)),                             # layer 2
        _REP_SPEC((1, H)), _REP_SPEC((1, H)),
        _REP_SPEC((H, H2)), _REP_SPEC((1, H2)),                           # head layer 1
        _REP_SPEC((1, H2)), _REP_SPEC((1, 1)),                            # head layer 2
    ]
    # Lane-dense output: (1, bb) blocks of a (1, n_blocks*bb) row; sliced to B below.
    out_specs = pl.BlockSpec((1, bb), lambda i: (0, i))

    kernel = functools.partial(
        value_critic_kernel,
        compute_dtype=jnp.bfloat16 if use_bf16 else jnp.float32,
    )

    out = pl.pallas_call(
        kernel,
        out_shape=jax.ShapeDtypeStruct((1, n_blocks * bb), jnp.float32),
        grid_spec=pl.GridSpec(grid=grid, in_specs=in_specs, out_specs=out_specs),
        compiler_params=pltpu.CompilerParams(
            dimension_semantics=("parallel",),
            vmem_limit_bytes=vmem_limit,
        ),
    )(state, w1, b1r, g1r, be1r, w2, b2r, g2r, be2r, w3, b3r, w4r, b4r)

    return out.reshape(n_blocks * bb, 1)[:B]


def init_params(key, state_dim, hidden_dim):
    """Deterministic synthetic parameter init (PyTorch-like uniform fan-in scaling)."""
    ks = jax.random.split(key, 8)
    H, H2 = hidden_dim, hidden_dim // 2

    def lin(k, fin, fout):
        bound = 1.0 / np.sqrt(fin)
        kw, kb = jax.random.split(k)
        w = jax.random.uniform(kw, (fin, fout), jnp.float32, -bound, bound)
        b = jax.random.uniform(kb, (fout,), jnp.float32, -bound, bound)
        return w, b

    w1, b1 = lin(ks[0], state_dim, H)
    w2, b2 = lin(ks[1], H, H)
    w3, b3 = lin(ks[2], H, H2)
    w4, b4 = lin(ks[3], H2, 1)
    # LayerNorm affine params (perturbed away from identity so the test is non-trivial).
    g1 = 1.0 + 0.05 * jax.random.normal(ks[4], (H,), jnp.float32)
    be1 = 0.05 * jax.random.normal(ks[5], (H,), jnp.float32)
    g2 = 1.0 + 0.05 * jax.random.normal(ks[6], (H,), jnp.float32)
    be2 = 0.05 * jax.random.normal(ks[7], (H,), jnp.float32)
    return (w1, b1, g1, be1, w2, b2, g2, be2, w3, b3, w4, b4)


def reference_forward(state, params):
    """Pure-JAX reference mirroring the PyTorch module."""
    (w1, b1, g1, be1, w2, b2, g2, be2, w3, b3, w4, b4) = params

    def ln(h, g, be):
        mu = jnp.mean(h, axis=-1, keepdims=True)
        var = jnp.mean((h - mu) ** 2, axis=-1, keepdims=True)
        return (h - mu) / jnp.sqrt(var + LN_EPS) * g + be

    h = jnp.maximum(ln(state @ w1 + b1, g1, be1), 0.0)
    h = jnp.maximum(ln(h @ w2 + b2, g2, be2), 0.0)
    h = jnp.maximum(h @ w3 + b3, 0.0)
    return h @ w4 + b4


if __name__ == "__main__":
    batch, state_dim, hidden_dim = 8, 32, 32

    key = jax.random.PRNGKey(0)
    k_state, k_params = jax.random.split(key)
    state = jax.random.normal(k_state, (batch, state_dim), jnp.float32)
    params = init_params(k_params, state_dim, hidden_dim)

    out = value_critic_forward(state, params)
    out = jax.block_until_ready(out)

    ref = reference_forward(state, params)
    assert out.shape == (batch, 1), out.shape
    np.testing.assert_allclose(np.asarray(out), np.asarray(ref), rtol=2e-5, atol=2e-5)

    print("KERNEL_OK")
</pallas_src>

<mosaic_0001>
module attributes {stable_mosaic.version = 11 : i64} {
  func.func @value_critic_kernel(%arg0: i32, %arg1: memref<8x32xf32, #tpu.memory_space<vmem>>, %arg2: memref<32x32xf32, #tpu.memory_space<vmem>>, %arg3: memref<1x32xf32, #tpu.memory_space<vmem>>, %arg4: memref<1x32xf32, #tpu.memory_space<vmem>>, %arg5: memref<1x32xf32, #tpu.memory_space<vmem>>, %arg6: memref<32x32xf32, #tpu.memory_space<vmem>>, %arg7: memref<1x32xf32, #tpu.memory_space<vmem>>, %arg8: memref<1x32xf32, #tpu.memory_space<vmem>>, %arg9: memref<1x32xf32, #tpu.memory_space<vmem>>, %arg10: memref<32x16xf32, #tpu.memory_space<vmem>>, %arg11: memref<1x16xf32, #tpu.memory_space<vmem>>, %arg12: memref<1x16xf32, #tpu.memory_space<vmem>>, %arg13: memref<1x1xf32, #tpu.memory_space<vmem>>, %arg14: memref<1x8xf32, #tpu.memory_space<vmem>>) attributes {dimension_semantics = [#tpu.dimension_semantics<parallel>], iteration_bounds = array<i64: 1>, scalar_prefetch = 0 : i64, scratch_operands = 0 : i64, tpu.core_type = #tpu.core_type<tc>, window_params = [{transform_indices = @transform_0, window_bounds = array<i64: 8, 32>}, {pipeline_mode = #tpu.pipeline_mode<synchronous>, transform_indices = @transform_1, window_bounds = array<i64: 32, 32>}, {pipeline_mode = #tpu.pipeline_mode<synchronous>, transform_indices = @transform_2, window_bounds = array<i64: 1, 32>}, {pipeline_mode = #tpu.pipeline_mode<synchronous>, transform_indices = @transform_3, window_bounds = array<i64: 1, 32>}, {pipeline_mode = #tpu.pipeline_mode<synchronous>, transform_indices = @transform_4, window_bounds = array<i64: 1, 32>}, {pipeline_mode = #tpu.pipeline_mode<synchronous>, transform_indices = @transform_5, window_bounds = array<i64: 32, 32>}, {pipeline_mode = #tpu.pipeline_mode<synchronous>, transform_indices = @transform_6, window_bounds = array<i64: 1, 32>}, {pipeline_mode = #tpu.pipeline_mode<synchronous>, transform_indices = @transform_7, window_bounds = array<i64: 1, 32>}, {pipeline_mode = #tpu.pipeline_mode<synchronous>, transform_indices = @transform_8, window_bounds = array<i64: 1, 32>}, {pipeline_mode = #tpu.pipeline_mode<synchronous>, transform_indices = @transform_9, window_bounds = array<i64: 32, 16>}, {pipeline_mode = #tpu.pipeline_mode<synchronous>, transform_indices = @transform_10, window_bounds = array<i64: 1, 16>}, {pipeline_mode = #tpu.pipeline_mode<synchronous>, transform_indices = @transform_11, window_bounds = array<i64: 1, 16>}, {pipeline_mode = #tpu.pipeline_mode<synchronous>, transform_indices = @transform_12, window_bounds = array<i64: 1, 1>}, {transform_indices = @transform_13, window_bounds = array<i64: 1, 8>}]} {
    %c0 = arith.constant 0 : index
    %c0_0 = arith.constant 0 : index
    %0 = vector.load %arg1[%c0, %c0_0] : memref<8x32xf32, #tpu.memory_space<vmem>>, vector<8x32xf32>
    %c0_1 = arith.constant 0 : index
    %c0_2 = arith.constant 0 : index
    %1 = vector.load %arg2[%c0_1, %c0_2] : memref<32x32xf32, #tpu.memory_space<vmem>>, vector<32x32xf32>
    %cst = arith.constant dense<0.000000e+00> : vector<8x32xf32>
    %2 = tpu.matmul %0, %1, %cst {dimension_numbers = #tpu.dot_dimension_numbers<[1], [0], [0], [1], [0, 0, 1, 1], [], []>} : vector<8x32xf32>, vector<32x32xf32>, vector<8x32xf32> -> vector<8x32xf32>
    %c0_3 = arith.constant 0 : index
    %c0_4 = arith.constant 0 : index
    %3 = vector.load %arg3[%c0_3, %c0_4] : memref<1x32xf32, #tpu.memory_space<vmem>>, vector<1x32xf32>
    %4 = vector.broadcast %3 : vector<1x32xf32> to vector<8x32xf32>
    %5 = arith.addf %2, %4 : vector<8x32xf32>
    %c0_5 = arith.constant 0 : index
    %c0_6 = arith.constant 0 : index
    %6 = vector.load %arg4[%c0_5, %c0_6] : memref<1x32xf32, #tpu.memory_space<vmem>>, vector<1x32xf32>
    %c0_7 = arith.constant 0 : index
    %c0_8 = arith.constant 0 : index
    %7 = vector.load %arg5[%c0_7, %c0_8] : memref<1x32xf32, #tpu.memory_space<vmem>>, vector<1x32xf32>
    %cst_9 = arith.constant dense<0.000000e+00> : vector<8xf32>
    %8 = vector.multi_reduction <add>, %5, %cst_9 [1] : vector<8x32xf32> to vector<8xf32>
    %9 = vector.shape_cast %8 : vector<8xf32> to vector<8x1xf32>
    %cst_10 = arith.constant 3.200000e+01 : f32
    %10 = vector.broadcast %cst_10 : f32 to vector<8x1xf32>
    %11 = arith.divf %9, %10 : vector<8x1xf32>
    %12 = vector.broadcast %11 : vector<8x1xf32> to vector<8x32xf32>
    %13 = arith.subf %5, %12 : vector<8x32xf32>
    %14 = arith.mulf %13, %13 : vector<8x32xf32>
    %cst_11 = arith.constant dense<0.000000e+00> : vector<8xf32>
    %15 = vector.multi_reduction <add>, %14, %cst_11 [1] : vector<8x32xf32> to vector<8xf32>
    %16 = vector.shape_cast %15 : vector<8xf32> to vector<8x1xf32>
    %cst_12 = arith.constant 3.200000e+01 : f32
    %17 = vector.broadcast %cst_12 : f32 to vector<8x1xf32>
    %18 = arith.divf %16, %17 : vector<8x1xf32>
    %cst_13 = arith.constant 9.99999974E-6 : f32
    %19 = vector.broadcast %cst_13 : f32 to vector<8x1xf32>
    %20 = arith.addf %18, %19 : vector<8x1xf32>
    %21 = math.rsqrt %20 : vector<8x1xf32>
    %22 = vector.broadcast %21 : vector<8x1xf32> to vector<8x32xf32>
    %23 = arith.mulf %13, %22 : vector<8x32xf32>
    %24 = vector.broadcast %6 : vector<1x32xf32> to vector<8x32xf32>
    %25 = arith.mulf %23, %24 : vector<8x32xf32>
    %26 = vector.broadcast %7 : vector<1x32xf32> to vector<8x32xf32>
    %27 = arith.addf %25, %26 : vector<8x32xf32>
    %cst_14 = arith.constant 0.000000e+00 : f32
    %28 = vector.broadcast %cst_14 : f32 to vector<8x32xf32>
    %29 = arith.maximumf %27, %28 : vector<8x32xf32>
    %c0_15 = arith.constant 0 : index
    %c0_16 = arith.constant 0 : index
    %30 = vector.load %arg6[%c0_15, %c0_16] : memref<32x32xf32, #tpu.memory_space<vmem>>, vector<32x32xf32>
    %cst_17 = arith.constant dense<0.000000e+00> : vector<8x32xf32>
    %31 = tpu.matmul %29, %30, %cst_17 {dimension_numbers = #tpu.dot_dimension_numbers<[1], [0], [0], [1], [0, 0, 1, 1], [], []>} : vector<8x32xf32>, vector<32x32xf32>, vector<8x32xf32> -> vector<8x32xf32>
    %c0_18 = arith.constant 0 : index
    %c0_19 = arith.constant 0 : index
    %32 = vector.load %arg7[%c0_18, %c0_19] : memref<1x32xf32, #tpu.memory_space<vmem>>, vector<1x32xf32>
    %33 = vector.broadcast %32 : vector<1x32xf32> to vector<8x32xf32>
    %34 = arith.addf %31, %33 : vector<8x32xf32>
    %c0_20 = arith.constant 0 : index
    %c0_21 = arith.constant 0 : index
    %35 = vector.load %arg8[%c0_20, %c0_21] : memref<1x32xf32, #tpu.memory_space<vmem>>, vector<1x32xf32>
    %c0_22 = arith.constant 0 : index
    %c0_23 = arith.constant 0 : index
    %36 = vector.load %arg9[%c0_22, %c0_23] : memref<1x32xf32, #tpu.memory_space<vmem>>, vector<1x32xf32>
    %cst_24 = arith.constant dense<0.000000e+00> : vector<8xf32>
    %37 = vector.multi_reduction <add>, %34, %cst_24 [1] : vector<8x32xf32> to vector<8xf32>
    %38 = vector.shape_cast %37 : vector<8xf32> to vector<8x1xf32>
    %cst_25 = arith.constant 3.200000e+01 : f32
    %39 = vector.broadcast %cst_25 : f32 to vector<8x1xf32>
    %40 = arith.divf %38, %39 : vector<8x1xf32>
    %41 = vector.broadcast %40 : vector<8x1xf32> to vector<8x32xf32>
    %42 = arith.subf %34, %41 : vector<8x32xf32>
    %43 = arith.mulf %42, %42 : vector<8x32xf32>
    %cst_26 = arith.constant dense<0.000000e+00> : vector<8xf32>
    %44 = vector.multi_reduction <add>, %43, %cst_26 [1] : vector<8x32xf32> to vector<8xf32>
    %45 = vector.shape_cast %44 : vector<8xf32> to vector<8x1xf32>
    %cst_27 = arith.constant 3.200000e+01 : f32
    %46 = vector.broadcast %cst_27 : f32 to vector<8x1xf32>
    %47 = arith.divf %45, %46 : vector<8x1xf32>
    %cst_28 = arith.constant 9.99999974E-6 : f32
    %48 = vector.broadcast %cst_28 : f32 to vector<8x1xf32>
    %49 = arith.addf %47, %48 : vector<8x1xf32>
    %50 = math.rsqrt %49 : vector<8x1xf32>
    %51 = vector.broadcast %50 : vector<8x1xf32> to vector<8x32xf32>
    %52 = arith.mulf %42, %51 : vector<8x32xf32>
    %53 = vector.broadcast %35 : vector<1x32xf32> to vector<8x32xf32>
    %54 = arith.mulf %52, %53 : vector<8x32xf32>
    %55 = vector.broadcast %36 : vector<1x32xf32> to vector<8x32xf32>
    %56 = arith.addf %54, %55 : vector<8x32xf32>
    %cst_29 = arith.constant 0.000000e+00 : f32
    %57 = vector.broadcast %cst_29 : f32 to vector<8x32xf32>
    %58 = arith.maximumf %56, %57 : vector<8x32xf32>
    %c0_30 = arith.constant 0 : index
    %c0_31 = arith.constant 0 : index
    %59 = vector.load %arg10[%c0_30, %c0_31] : memref<32x16xf32, #tpu.memory_space<vmem>>, vector<32x16xf32>
    %cst_32 = arith.constant dense<0.000000e+00> : vector<8x16xf32>
    %60 = tpu.matmul %58, %59, %cst_32 {dimension_numbers = #tpu.dot_dimension_numbers<[1], [0], [0], [1], [0, 0, 1, 1], [], []>} : vector<8x32xf32>, vector<32x16xf32>, vector<8x16xf32> -> vector<8x16xf32>
    %c0_33 = arith.constant 0 : index
    %c0_34 = arith.constant 0 : index
    %61 = vector.load %arg11[%c0_33, %c0_34] : memref<1x16xf32, #tpu.memory_space<vmem>>, vector<1x16xf32>
    %62 = vector.broadcast %61 : vector<1x16xf32> to vector<8x16xf32>
    %63 = arith.addf %60, %62 : vector<8x16xf32>
    %cst_35 = arith.constant 0.000000e+00 : f32
    %64 = vector.broadcast %cst_35 : f32 to vector<8x16xf32>
    %65 = arith.maximumf %63, %64 : vector<8x16xf32>
    %c0_36 = arith.constant 0 : index
    %c0_37 = arith.constant 0 : index
    %66 = vector.load %arg12[%c0_36, %c0_37] : memref<1x16xf32, #tpu.memory_space<vmem>>, vector<1x16xf32>
    %cst_38 = arith.constant dense<0.000000e+00> : vector<1x8xf32>
    %67 = tpu.matmul %66, %65, %cst_38 {dimension_numbers = #tpu.dot_dimension_numbers<[1], [1], [0], [0], [0, 0, 1, 0], [], []>} : vector<1x16xf32>, vector<8x16xf32>, vector<1x8xf32> -> vector<1x8xf32>
    %c0_39 = arith.constant 0 : index
    %c0_40 = arith.constant 0 : index
    %68 = vector.load %arg13[%c0_39, %c0_40] : memref<1x1xf32, #tpu.memory_space<vmem>>, vector<1x1xf32>
    %69 = vector.broadcast %68 : vector<1x1xf32> to vector<1x8xf32>
    %70 = arith.addf %67, %69 : vector<1x8xf32>
    %c0_41 = arith.constant 0 : index
    %c0_42 = arith.constant 0 : index
    %71 = vector.load %arg14[%c0_41, %c0_42] : memref<1x8xf32, #tpu.memory_space<vmem>>, vector<1x8xf32>
    tpu.vector_store %arg14[%c0_41, %c0_42], %70 {strides = array<i32>} : memref<1x8xf32, #tpu.memory_space<vmem>>, vector<1x8xf32>,
    return
  }
  func.func @transform_0(%arg0: i32) -> (i32, i32) {
    %c0_i32 = arith.constant 0 : i32
    %c0_i32_0 = arith.constant 0 : i32
    return %arg0, %c0_i32 : i32, i32
  }
  func.func @transform_1(%arg0: i32) -> (i32, i32) {
    %c0_i32 = arith.constant 0 : i32
    %c0_i32_0 = arith.constant 0 : i32
    %c0_i32_1 = arith.constant 0 : i32
    return %c0_i32, %c0_i32_0 : i32, i32
  }
  func.func @transform_2(%arg0: i32) -> (i32, i32) {
    %c0_i32 = arith.constant 0 : i32
    %c0_i32_0 = arith.constant 0 : i32
    %c0_i32_1 = arith.constant 0 : i32
    return %c0_i32, %c0_i32_0 : i32, i32
  }
  func.func @transform_3(%arg0: i32) -> (i32, i32) {
    %c0_i32 = arith.constant 0 : i32
    %c0_i32_0 = arith.constant 0 : i32
    %c0_i32_1 = arith.constant 0 : i32
    return %c0_i32, %c0_i32_0 : i32, i32
  }
  func.func @transform_4(%arg0: i32) -> (i32, i32) {
    %c0_i32 = arith.constant 0 : i32
    %c0_i32_0 = arith.constant 0 : i32
    %c0_i32_1 = arith.constant 0 : i32
    return %c0_i32, %c0_i32_0 : i32, i32
  }
  func.func @transform_5(%arg0: i32) -> (i32, i32) {
    %c0_i32 = arith.constant 0 : i32
    %c0_i32_0 = arith.constant 0 : i32
    %c0_i32_1 = arith.constant 0 : i32
    return %c0_i32, %c0_i32_0 : i32, i32
  }
  func.func @transform_6(%arg0: i32) -> (i32, i32) {
    %c0_i32 = arith.constant 0 : i32
    %c0_i32_0 = arith.constant 0 : i32
    %c0_i32_1 = arith.constant 0 : i32
    return %c0_i32, %c0_i32_0 : i32, i32
  }
  func.func @transform_7(%arg0: i32) -> (i32, i32) {
    %c0_i32 = arith.constant 0 : i32
    %c0_i32_0 = arith.constant 0 : i32
    %c0_i32_1 = arith.constant 0 : i32
    return %c0_i32, %c0_i32_0 : i32, i32
  }
  func.func @transform_8(%arg0: i32) -> (i32, i32) {
    %c0_i32 = arith.constant 0 : i32
    %c0_i32_0 = arith.constant 0 : i32
    %c0_i32_1 = arith.constant 0 : i32
    return %c0_i32, %c0_i32_0 : i32, i32
  }
  func.func @transform_9(%arg0: i32) -> (i32, i32) {
    %c0_i32 = arith.constant 0 : i32
    %c0_i32_0 = arith.constant 0 : i32
    %c0_i32_1 = arith.constant 0 : i32
    return %c0_i32, %c0_i32_0 : i32, i32
  }
  func.func @transform_10(%arg0: i32) -> (i32, i32) {
    %c0_i32 = arith.constant 0 : i32
    %c0_i32_0 = arith.constant 0 : i32
    %c0_i32_1 = arith.constant 0 : i32
    return %c0_i32, %c0_i32_0 : i32, i32
  }
  func.func @transform_11(%arg0: i32) -> (i32, i32) {
    %c0_i32 = arith.constant 0 : i32
    %c0_i32_0 = arith.constant 0 : i32
    %c0_i32_1 = arith.constant 0 : i32
    return %c0_i32, %c0_i32_0 : i32, i32
  }
  func.func @transform_12(%arg0: i32) -> (i32, i32) {
    %c0_i32 = arith.constant 0 : i32
    %c0_i32_0 = arith.constant 0 : i32
    %c0_i32_1 = arith.constant 0 : i32
    return %c0_i32, %c0_i32_0 : i32, i32
  }
  func.func @transform_13(%arg0: i32) -> (i32, i32) {
    %c0_i32 = arith.constant 0 : i32
    %c0_i32_0 = arith.constant 0 : i32
    return %c0_i32, %arg0 : i32, i32
  }
}

</mosaic_0001>

<bundles_post_ra>
// kernel: value_critic_forward.1
= control target key start
LH: loop header
LB: loop body
LE: loop exit
PB: predicated region body
PF: predicated region fallthrough
CT: control target
= control target key end

     0   :  { %s507_s0 = inlined_call_operand.vmem [shape: f32[8,32], index: 0, kind: input, shape index: {}]   ;;  %s508_s1 = inlined_call_operand.vmem [shape: f32[32,32], index: 1, kind: input, shape index: {}]   ;;  %s509_s2 = inlined_call_operand.vmem [shape: f32[1,32], index: 2, kind: input, shape index: {}]   ;;  %s510_s3 = inlined_call_operand.vmem [shape: f32[1,32], index: 3, kind: input, shape index: {}]   ;;  %s511_s4 = inlined_call_operand.vmem [shape: f32[1,32], index: 4, kind: input, shape index: {}]   ;;  %s512_s5 = inlined_call_operand.hbm [shape: f32[32,32], index: 5, kind: input, shape index: {}]   ;;  %s513_s6 = inlined_call_operand.vmem [shape: f32[1,32], index: 6, kind: input, shape index: {}]   ;;  %s514_s7 = inlined_call_operand.vmem [shape: f32[1,32], index: 7, kind: input, shape index: {}]   ;;  %s515_s8 = inlined_call_operand.vmem [shape: f32[1,32], index: 8, kind: input, shape index: {}]   ;;  %s516_s9 = inlined_call_operand.vmem [shape: f32[32,16], index: 9, kind: input, shape index: {}]   ;;  %s517_s10 = inlined_call_operand.vmem [shape: f32[1,16], index: 10, kind: input, shape index: {}]   ;;  %s518_s11 = inlined_call_operand.vmem [shape: f32[1,16], index: 11, kind: input, shape index: {}]   ;;  %s519_s12 = inlined_call_operand.<no memory space> [shape: f32[1,1], index: 12, kind: input, shape index: {}]   ;;  %s520_s13 = inlined_call_operand.hbm [shape: f32[1,8], index: 13, kind: output, shape index: {}]  }
   0x1   :  { %v18_v0 = vstv %s519_s12 }
   0x2   :  { %19 = vst [vmem:[#allocation2] sm:$0x1] %v18_v0 }
   0x3   :  { %20 = vsyncpa [#allocation4], 0 }
   0x4   :  { %21 = vsyncpa [#allocation5], 0  ;;  %s36_s29 = sshll.u32 %s512_s5, 4  ;;  %s364_s30 = smov [#allocation3]   ;;  %s37_s29 = int_to_ptr.hbm [resolvable:$true] %s36_s29 }
   0x5   :  { %s38_s14 = sshll.u32 %s364_s30, 4  ;;  %s365_s15 = smov 128   ;;  %s39_s14 = int_to_ptr.vmem [resolvable:$true] %s38_s14 }
   0x6   :  { %s366_s16 = smov 8  }
   0x7   :  { %44 = dma.hbm_to_vmem [thread:$0]  %s37_s29, 512, %s39_s14, [#allocation4], %s365_s15, %s365_s15, %s366_s16  }
   0x8   :  { %360 = dma.done.wait [#allocation4], 512  }
   0x9   :  { %361 = vsyncadd [#allocation4], 4294966784  ;;  %v67_v1 = vld [vmem:[%s508_s1 + $0x18] sm:$0xff]  ;;  %v66_v2 = vld [vmem:[%s508_s1 + $0x10] sm:$0xff]  ;;  %vm72_vm0 = vcmask 261120   ;;  %v367_v10 = vmov 32.0  }
   0xa   :  { %88 = vmatpush.msra.mxu0 %v67_v1  ;;  %v65_v3 = vld [vmem:[%s508_s1 + $0x8] sm:$0xff]  ;;  %v64_v4 = vld [vmem:[%s508_s1] sm:$0xff]  ;;  %306 = vrcp.f32 %v367_v10  ;;  %v138_v23 = vld [vmem:[#allocation3 + $0x10] sm:$0xff]  ;;  %vm240_vm8 = vcmask 130048   ;;  %s369_s21 = smov [#allocation6]   ;;  %s276_s25 = sshll.u32 %s520_s13, 4  ;;  %s277_s25 = int_to_ptr.hbm [resolvable:$true] %s276_s25 }
   0xb   :  { %v63_v5 = vld [vmem:[%s507_s0] sm:$0xff]  ;;  %v137_v24 = vld [vmem:[#allocation3 + $0x8] sm:$0xff]  ;;  %v203_v51 = vld [vmem:[%s516_s9 + $0x18] sm:$0xff]  ;;  %s274_s22 = sshll.u32 %s369_s21, 4  ;;  %vm267_vm9 = vcmask 57344   ;;  %s275_s22 = int_to_ptr.vmem [resolvable:$true] %s274_s22 }
   0xc   :  { %89 = vmatpush.msra.mxu0 %v66_v2  ;;  %v299_v6 = vld [vmem:[%s509_s2] ss:$0 sm:$0xff]  ;;  %v136_v25 = vld [vmem:[#allocation3] sm:$0xff]  ;;  %v202_v52 = vld [vmem:[%s516_s9 + $0x10] sm:$0xff]  ;;  %223 = vmatpush.msra.mxu2 %v203_v51 }
   0xd   :  { %v139_v22 = vld [vmem:[#allocation3 + $0x18] sm:$0xff]  ;;  %v201_v53 = vld [vmem:[%s516_s9 + $0x8] sm:$0xff] }
   0xe   :  { %90 = vmatpush.msra.mxu0 %v65_v3  ;;  %159 = vmatpush.msra.mxu1 %v139_v22  ;;  %v300_v35 = vld [vmem:[%s510_s3] ss:$0 sm:$0xff] }
   0xf   :  { %v301_v38 = vld [vmem:[%s511_s4] ss:$0 sm:$0xff]  ;;  %224 = vmatpush.msra.mxu2 %v202_v52 }
  0x10   :  { %91 = vmatpush.msra.mxu0 %v64_v4  ;;  %v307_v11 = vpop.eup %306  ;;  %160 = vmatpush.msra.mxu1 %v138_v23  ;;  %v302_v42 = vld [vmem:[%s513_s6] ss:$0 sm:$0xff] }
  0x11   :  { %286 = vmatmul.msk.f32.vlgmr.msra.gmra.mxu0 %vm72_vm0, %v63_v5  ;;  %v102_v12 = vmul.f32 32.0, %v307_v11  ;;  %vm106_vm1 = vweird.f32 %v307_v11  ;;  %v200_v54 = vld [vmem:[%s516_s9] sm:$0xff]  ;;  %225 = vmatpush.msra.mxu2 %v201_v53 }
  0x12   :  { %161 = vmatpush.msra.mxu1 %v137_v24  ;;  %v303_v0 = vld [vmem:[%s514_s7] ss:$0 sm:$0xff] }
  0x13   :  { %v103_v13 = vsub.f32 1.0, %v102_v12  ;;  %226 = vmatpush.msra.mxu2 %v200_v54  ;;  %v304_v3 = vld [vmem:[%s515_s8] ss:$0 sm:$0xff] }
  0x14   :  { %162 = vmatpush.msra.mxu1 %v136_v25 }
  0x15   :  { %v104_v14 = vmul.f32 %v307_v11, %v103_v13  ;;  %v232_v13 = vld [vmem:[%s518_s11] sm:$0x1] }
  0x17   :  { %v105_v15 = vadd.f32 %v307_v11, %v104_v14 }
  0x19   :  { %v107_v16 = vsel %vm106_vm1, %v307_v11, %v105_v15 }
  0x8e   :  { %v93_v7 = vpop.f32.mrf.mxu0 }
  0x8f   :  { %v94_v8 = vadd.f32 %v299_v6, %v93_v7  ;;  %v233_v7 = vld [vmem:[#allocation2] sm:$0x1] }
  0x91   :  { %v98_v9 = vsel %vm72_vm0, %v94_v8, 0.0 }
  0x92   :  { %99 = vadd.xlane.f32.xlu0 %v98_v9  ;;  %v305_v9 = vld [vmem:[%s517_s10] ss:$0 sm:$0xff] }
 0x105   :  { %v100_v17 = vpop.xlane.xlu0 %99 }
 0x106   :  { %v108_v18 = vmul.f32 %v107_v16, %v100_v17 }
 0x108   :  { %v109_v19 = vsub.f32 %v94_v8, %v108_v18  ;;  %v368_v8 = vmov 0  }
 0x109   :  { %297 = vset.pattern.permute.xlu2 %v368_v8  ;;  %298 = vset.pattern.permute.xlu0 %v368_v8 }
 0x10a   :  { %v110_v20 = vmul.f32 %v109_v19, %v109_v19  ;;  %236 = vperm.xlu2 %297, %v233_v7  }
 0x10c   :  { %v111_v21 = vsel %vm72_vm0, %v110_v20, 0.0 }
 0x10d   :  { %112 = vadd.xlane.f32.xlu0 %v111_v21 }
 0x164   :  { %v237_v14 = vpop.permute.xlu2 %236 }
 0x165   :  { %v239_v15 = vperm.slane %v237_v14, 0 }
 0x180   :  { %v113_v26 = vpop.xlane.xlu0 %112 }
 0x181   :  { %v114_v27 = vmul.f32 %v113_v26, %v107_v16 }
 0x183   :  { %v115_v28 = vadd.f32 1e-05, %v114_v27 }
 0x185   :  { %308 = vrsqrt.f32 %v115_v28  ;;  %vm122_vm3 = vweird.f32 %v115_v28 }
 0x18b   :  { %v309_v29 = vpop.eup %308 }
 0x18c   :  { %v117_v30 = vmul.f32 %v309_v29, %v115_v28  ;;  %vm123_vm2 = vweird.f32 %v309_v29 }
 0x18d   :  { %vm124_vm4 = vmor %vm122_vm3, %vm123_vm2 }
 0x18e   :  { %v118_v31 = vmul.f32 %v309_v29, %v117_v30 }
 0x190   :  { %v119_v32 = vmul.f32 0.5, %v118_v31 }
 0x192   :  { %v120_v33 = vsub.f32 1.5, %v119_v32 }
 0x194   :  { %v121_v34 = vmul.f32 %v309_v29, %v120_v33 }
 0x196   :  { %v125_v36 = vsel %vm124_vm4, %v309_v29, %v121_v34 }
 0x197   :  { %v126_v37 = vmul.f32 %v125_v36, %v109_v19 }
 0x199   :  { %v130_v39 = vmul.f32 %v300_v35, %v126_v37 }
 0x19b   :  { %v134_v40 = vadd.f32 %v301_v38, %v130_v39 }
 0x19d   :  { %v135_v41 = vmax.f32 %v134_v40, 0.0 }
 0x19f   :  { %287 = vmatmul.msk.f32.vlgmr.msra.gmra.mxu1 %vm72_vm0, %v135_v41 }
 0x21c   :  { %v164_v43 = vpop.f32.mrf.mxu1 }
 0x21d   :  { %v165_v44 = vadd.f32 %v302_v42, %v164_v43 }
 0x21f   :  { %v169_v45 = vsel %vm72_vm0, %v165_v44, 0.0 }
 0x220   :  { %170 = vadd.xlane.f32.xlu1 %v169_v45 }
 0x293   :  { %v171_v46 = vpop.xlane.xlu1 %170 }
 0x294   :  { %v172_v47 = vmul.f32 %v171_v46, %v107_v16 }
 0x296   :  { %v173_v48 = vsub.f32 %v165_v44, %v172_v47 }
 0x298   :  { %v174_v49 = vmul.f32 %v173_v48, %v173_v48 }
 0x29a   :  { %v175_v50 = vsel %vm72_vm0, %v174_v49, 0.0 }
 0x29b   :  { %176 = vadd.xlane.f32.xlu1 %v175_v50 }
 0x30e   :  { %v177_v55 = vpop.xlane.xlu1 %176 }
 0x30f   :  { %v178_v56 = vmul.f32 %v177_v55, %v107_v16 }
 0x311   :  { %v179_v57 = vadd.f32 1e-05, %v178_v56 }
 0x313   :  { %310 = vrsqrt.f32 %v179_v57  ;;  %vm186_vm6 = vweird.f32 %v179_v57 }
 0x319   :  { %v311_v58 = vpop.eup %310 }
 0x31a   :  { %v181_v59 = vmul.f32 %v311_v58, %v179_v57  ;;  %vm187_vm5 = vweird.f32 %v311_v58 }
 0x31b   :  { %vm188_vm7 = vmor %vm186_vm6, %vm187_vm5 }
 0x31c   :  { %v182_v60 = vmul.f32 %v311_v58, %v181_v59 }
 0x31e   :  { %v183_v61 = vmul.f32 0.5, %v182_v60 }
 0x320   :  { %v184_v62 = vsub.f32 1.5, %v183_v61 }
 0x322   :  { %v185_v63 = vmul.f32 %v311_v58, %v184_v62 }
 0x324   :  { %v189_v1 = vsel %vm188_vm7, %v311_v58, %v185_v63 }
 0x325   :  { %v190_v2 = vmul.f32 %v189_v1, %v173_v48 }
 0x327   :  { %v194_v4 = vmul.f32 %v303_v0, %v190_v2 }
 0x329   :  { %v198_v5 = vadd.f32 %v304_v3, %v194_v4 }
 0x32b   :  { %v199_v6 = vmax.f32 %v198_v5, 0.0 }
 0x32d   :  { %288 = vmatmul.msk.f32.vlgmr.msra.gmra.mxu2 %vm72_vm0, %v199_v6 }
 0x3b0   :  { %v228_v10 = vpop.f32.mrf.mxu2 }
 0x3b1   :  { %v229_v11 = vadd.f32 %v305_v9, %v228_v10 }
 0x3b3   :  { %v231_v12 = vmax.f32 %v229_v11, 0.0 }
 0x3b5   :  { %289 = vmatpush.xpose.msk.msra.mxu3 %vm240_vm8, %v231_v12 }
 0x3b8   :  { %290 = vmatmul.msk.f32.vlgmr.msra.gmra.mxu3 %vm240_vm8, %v232_v13 }
 0x43b   :  { %v264_v16 = vpop.f32.mrf.mxu3 }
 0x43c   :  { %v265_v17 = vadd.f32 %v264_v16, %v239_v15 }
 0x43e   :  { %268 = vst.msk [vmem:[#allocation6] sm:$0x1] %vm267_vm9, %v265_v17 }
 0x43f   :  { %279 = dma.vmem_to_hbm [thread:$0]  %s275_s22, 16, %s277_s25, [#allocation5]  }
 0x440   :  { %362 = dma.done.wait [#allocation5], 16  }
 0x441   :  { %363 = vsyncadd [#allocation5], 4294967280 }
 0x442   :  { %284 = vsyncpa [#allocation4], 1 }
 0x443   :  { %285 = vsyncpa [#allocation5], 1 }

</bundles_post_ra>
